<compile_context>
chip_gen: v7x
topology: tpu7x:2x2x1
jax: 0.10.0
libtpu: 0.0.40
codegen_flags: <defaults>
</compile_context>

<pallas_src>
import jax
import jax.numpy as jnp
from jax import lax
from jax.experimental import pallas as pl
from jax.experimental.pallas import tpu as pltpu


# Contraction helpers:
#   _NT contracts the last dim of both operands  (rhs transposed)
#   _TN contracts the first dim of both operands (lhs transposed)
# Both are native MXU contraction forms -> no materialized (N,N) transpose.
_NT = (((1,), (1,)), ((), ()))
_TN = (((0,), (0,)), ((), ()))

_VMEM_LIMIT = 48 * 1024 * 1024  # safe on v5e/v6e (128 MiB) and v7x (64 MiB)


# ----------------------------------------------------------------------------
# Kernel 1: per-(meta-path, node-tile) prep — D^-1/2 and dinv-scaled projection
# grid = (K, N // TILE)
# ----------------------------------------------------------------------------
def gcn_prep_kernel(sim_ref, x_ref, w_ref, dinv_ref, z_ref):
    # sim_ref : (N, TILE)   columns `tile` of sims[k]  (i.e. sim[:, tile])
    # x_ref   : (TILE, Fin) feature rows of the tile's nodes
    # w_ref   : (Fin, D)    GCN weight of meta-path k
    # dinv_ref: (TILE, 1)   out: D^-1/2 for the tile's nodes
    # z_ref   : (TILE, D)   out: dinv * (x @ W) for the tile's nodes
    t = pl.program_id(1)
    slab = sim_ref[...]
    n, tile = slab.shape

    row = lax.broadcasted_iota(jnp.int32, (n, tile), 0)
    col = lax.broadcasted_iota(jnp.int32, (n, tile), 1)
    # off-diagonal incoming-edge mask; the self loop contributes exactly +1
    offdiag = jnp.where((slab != 0.0) & (row != col + t * tile), 1.0, 0.0)

    # deg[c] = 1 + sum_j offdiag[j, c]: column sums as a transposed-LHS matmul,
    # producing the (TILE, 1) column layout directly (no cross-lane relayout).
    ones = jnp.ones((n, 1), jnp.float32)
    deg = lax.dot_general(offdiag, ones, _TN,
                          preferred_element_type=jnp.float32) + 1.0
    dinv = lax.rsqrt(deg)                                            # (TILE, 1)

    xw = jnp.dot(x_ref[...], w_ref[...], preferred_element_type=jnp.float32)
    dinv_ref[...] = dinv
    z_ref[...] = dinv * xw                                           # (TILE, D)


# ----------------------------------------------------------------------------
# Kernel 2: row-tiled normalized aggregation + bias, max-accumulated over K.
# grid = (N // TILE, K), row axis "parallel", K innermost "arbitrary".
# ----------------------------------------------------------------------------
def gcn_agg_max_kernel(sim_ref, z_ref, dinv_ref, b_ref, out_ref, eye_ref):
    # sim_ref : (N, TILE)  columns `i`-tile of sims[k]
    # z_ref   : (N, D)     dinv-scaled projection of meta-path k (all nodes)
    # dinv_ref: (TILE, 1)  D^-1/2 for the output rows
    # b_ref   : (1, D)     bias of meta-path k
    # out_ref : (TILE, D)  f_meta rows (resident across the K axis)
    # eye_ref : (N, TILE)  scratch: self-loop mask, built once per row tile
    i = pl.program_id(0)
    k = pl.program_id(1)
    n, tile = sim_ref.shape

    @pl.when(k == 0)
    def _build_self_loop_mask():  # identical for every k -> hoisted to scratch
        row = lax.broadcasted_iota(jnp.int32, (n, tile), 0)
        col = lax.broadcasted_iota(jnp.int32, (n, tile), 1)
        eye_ref[...] = (row == col + i * tile).astype(jnp.float32)

    # ahat[j, c] = 1 iff sim[j, i_tile + c] != 0  or  j == i_tile + c
    ahat = jnp.where(sim_ref[...] != 0.0, 1.0, eye_ref[...])         # (N, TILE)
    # agg[c, d] = sum_j ahat[j, c] * z[j, d]   (transposed-LHS MXU contraction)
    agg = lax.dot_general(ahat, z_ref[...], _TN,
                          preferred_element_type=jnp.float32)         # (TILE, D)
    h = dinv_ref[...] * agg + b_ref[...]

    @pl.when(k == 0)
    def _init():
        out_ref[...] = h

    @pl.when(k > 0)
    def _max():
        out_ref[...] = jnp.maximum(out_ref[...], h)                  # 'max' agg


# ----------------------------------------------------------------------------
# Kernel 3: row tile of A_meta = sum_k attention_k * sims_k
# grid = (N // TILE,)
# ----------------------------------------------------------------------------
def attention_ameta_kernel(fm_tile_ref, fm_all_ref, w1_ref, w2_ref, sims_ref,
                           ameta_ref):
    # fm_tile_ref: (TILE, D)   f_meta rows of this tile
    # fm_all_ref : (N, D)      all f_meta rows
    # w1_ref     : (K, D)      attention weight halves acting on f_meta[i]
    # w2_ref     : (K, D)      attention weight halves acting on f_meta[j]
    # sims_ref   : (K, TILE, N)
    # ameta_ref  : (TILE, N)
    n_meta = sims_ref.shape[0]

    # Fused, lane-packed attention projections (one matmul per side, not 2K).
    u = lax.dot_general(fm_tile_ref[...], w1_ref[...], _NT,
                        preferred_element_type=jnp.float32)           # (TILE, K)
    vt = lax.dot_general(w2_ref[...], fm_all_ref[...], _NT,
                         preferred_element_type=jnp.float32)          # (K, N)

    total = None
    weighted = None
    for k in range(n_meta):                                           # K static & small
        s = jnp.exp(jnp.maximum(u[:, k:k + 1] + vt[k:k + 1, :], 0.0))  # (TILE, N)
        total = s if total is None else total + s
        wk = s * sims_ref[k]
        weighted = wk if weighted is None else weighted + wk
    ameta_ref[...] = weighted * pl.reciprocal(total, approx=True)


# ----------------------------------------------------------------------------
# Wrappers
# ----------------------------------------------------------------------------
def _row_tile(n, cap=256):
    """Largest row tile <= cap that divides n (cap>=256 suits v6e/v7x MXUs)."""
    if n <= cap:
        return n
    for t in range(cap, 7, -8):
        if n % t == 0:
            return t
    return n


def _gcn_prep(sims, x, w, *, tile):
    k_meta, n, _ = sims.shape
    f_in = x.shape[1]
    d = w.shape[-1]
    return pl.pallas_call(
        gcn_prep_kernel,
        out_shape=(jax.ShapeDtypeStruct((k_meta, n, 1), jnp.float32),
                   jax.ShapeDtypeStruct((k_meta, n, d), jnp.float32)),
        grid_spec=pltpu.PrefetchScalarGridSpec(
            num_scalar_prefetch=0,
            grid=(k_meta, n // tile),
            in_specs=[
                pl.BlockSpec((pl.Squeezed(), n, tile), lambda k, t: (k, 0, t)),
                pl.BlockSpec((tile, f_in), lambda k, t: (t, 0)),
                pl.BlockSpec((pl.Squeezed(), f_in, d), lambda k, t: (k, 0, 0)),
            ],
            out_specs=(
                pl.BlockSpec((pl.Squeezed(), tile, 1), lambda k, t: (k, t, 0)),
                pl.BlockSpec((pl.Squeezed(), tile, d), lambda k, t: (k, t, 0)),
            ),
        ),
        compiler_params=pltpu.CompilerParams(
            dimension_semantics=("arbitrary", "parallel"),
            vmem_limit_bytes=_VMEM_LIMIT),
    )(sims, x, w)


def _gcn_agg_max(sims, z, dinv, b, *, tile):
    k_meta, n, _ = sims.shape
    d = z.shape[-1]
    return pl.pallas_call(
        gcn_agg_max_kernel,
        out_shape=jax.ShapeDtypeStruct((n, d), jnp.float32),
        grid_spec=pltpu.PrefetchScalarGridSpec(
            num_scalar_prefetch=0,
            grid=(n // tile, k_meta),
            in_specs=[
                pl.BlockSpec((pl.Squeezed(), n, tile), lambda i, k: (k, 0, i)),
                pl.BlockSpec((pl.Squeezed(), n, d), lambda i, k: (k, 0, 0)),
                pl.BlockSpec((pl.Squeezed(), tile, 1), lambda i, k: (k, i, 0)),
                pl.BlockSpec((pl.Squeezed(), 1, d), lambda i, k: (k, 0, 0)),
            ],
            out_specs=pl.BlockSpec((tile, d), lambda i, k: (i, 0)),
            scratch_shapes=[pltpu.VMEM((n, tile), jnp.float32)],
        ),
        compiler_params=pltpu.CompilerParams(
            dimension_semantics=("parallel", "arbitrary"),
            vmem_limit_bytes=_VMEM_LIMIT),
    )(sims, z, dinv, b)


def _attention_ameta(f_meta, w1, w2, sims, *, tile):
    k_meta, n, _ = sims.shape
    d = f_meta.shape[1]
    return pl.pallas_call(
        attention_ameta_kernel,
        out_shape=jax.ShapeDtypeStruct((n, n), jnp.float32),
        grid_spec=pltpu.PrefetchScalarGridSpec(
            num_scalar_prefetch=0,
            grid=(n // tile,),
            in_specs=[
                pl.BlockSpec((tile, d), lambda i: (i, 0)),
                pl.BlockSpec((n, d), lambda i: (0, 0)),
                pl.BlockSpec((k_meta, d), lambda i: (0, 0)),
                pl.BlockSpec((k_meta, d), lambda i: (0, 0)),
                pl.BlockSpec((k_meta, tile, n), lambda i: (0, i, 0)),
            ],
            out_specs=pl.BlockSpec((tile, n), lambda i: (i, 0)),
        ),
        compiler_params=pltpu.CompilerParams(
            dimension_semantics=("parallel",),
            vmem_limit_bytes=_VMEM_LIMIT),
    )(f_meta, f_meta, w1, w2, sims)


def hsgnn_forward(features, sims, w_gnn, b_gnn, att_w1, att_w2, w_f, b_f):
    tile = _row_tile(sims.shape[1], cap=256)

    # Stage 1: K parallel GCNConv layers + elementwise-max aggregation.
    dinv1, z1 = _gcn_prep(sims, features, w_gnn, tile=tile)
    f_meta = _gcn_agg_max(sims, z1, dinv1, b_gnn, tile=tile)

    # Stage 2: pairwise meta-path attention -> A_meta.
    w1 = att_w1[..., 0]                                  # (K, D) acts on f_meta[i]
    w2 = att_w2[..., 0]                                  # (K, D) acts on f_meta[j]
    a_meta = _attention_ameta(f_meta, w1, w2, sims, tile=tile)

    # Stage 3: final GCNConv on nonzero(A_meta) — reuse the GCN kernels, K = 1.
    dinv2, z2 = _gcn_prep(a_meta[None], f_meta, w_f[None], tile=tile)
    preds = _gcn_agg_max(a_meta[None], z2, dinv2, b_f[None], tile=tile)

    return f_meta, a_meta, preds


# ----------------------------------------------------------------------------
# Pure-JAX reference (same dense GCNConv semantics) for a correctness check.
# ----------------------------------------------------------------------------
def reference_forward(features, sims, w_gnn, b_gnn, att_w1, att_w2, w_f, b_f):
    n = features.shape[0]
    k_meta = sims.shape[0]
    eye = jnp.eye(n, dtype=jnp.float32)

    def gcn(x, pattern, w, b):
        adj = jnp.transpose((pattern != 0.0).astype(jnp.float32))
        ahat = jnp.maximum(adj, eye)
        deg = ahat.sum(1, keepdims=True)
        dinv = 1.0 / jnp.sqrt(deg)
        anorm = dinv * ahat * dinv.T
        return anorm @ (x @ w) + b

    hs = jnp.stack([gcn(features, sims[k], w_gnn[k], b_gnn[k])
                    for k in range(k_meta)])
    f_meta = jnp.max(hs, axis=0)

    u = jnp.concatenate([f_meta @ att_w1[k] for k in range(k_meta)], axis=1)
    v = jnp.concatenate([f_meta @ att_w2[k] for k in range(k_meta)], axis=1)
    scores = jnp.exp(jnp.maximum(u[:, None, :] + v[None, :, :], 0.0))  # (N,N,K)
    att = scores / scores.sum(-1, keepdims=True)
    a_meta = jnp.einsum('ijk,kij->ij', att, sims)

    preds = gcn(f_meta, a_meta, w_f, b_f)
    return f_meta, a_meta, preds


if __name__ == "__main__":
    # Small, module-consistent shapes: N nodes, K=3 meta-paths, output_dim=16.
    N, F_IN, D, K_META, C = 128, 32, 16, 3, 8

    key = jax.random.PRNGKey(0)
    ks = jax.random.split(key, 7)

    features = jax.random.normal(ks[0], (N, F_IN), jnp.float32)

    # Symmetric, sparse-ish similarity matrices with zero diagonal.
    r = jax.random.uniform(ks[1], (K_META, N, N), jnp.float32)
    r = (r + jnp.transpose(r, (0, 2, 1))) * 0.5
    sims = jnp.where(r > 0.85, r, 0.0)
    sims = sims * (1.0 - jnp.eye(N, dtype=jnp.float32))[None]

    # Deterministic synthetic parameters (GCNConv weights, biases, attention).
    w_gnn = jax.random.normal(ks[2], (K_META, F_IN, D), jnp.float32) / jnp.sqrt(F_IN)
    b_gnn = jax.random.normal(ks[3], (K_META, 1, D), jnp.float32) * 0.1
    att_w = jax.random.normal(ks[4], (K_META, 2 * D, 1), jnp.float32) * 0.1
    att_w1 = att_w[:, :D, :]                    # acts on f_meta[i]
    att_w2 = att_w[:, D:, :]                    # acts on f_meta[j]
    w_f = jax.random.normal(ks[5], (D, C), jnp.float32) / jnp.sqrt(D)
    b_f = jax.random.normal(ks[6], (1, C), jnp.float32) * 0.1

    # TODO(synk): the original script builds edge_index via sparse .nonzero()
    # (and has a (nnz,2)-vs-(2,nnz) vstack quirk for A_meta); this kernel uses
    # the equivalent dense normalized-adjacency formulation instead.

    out = hsgnn_forward(features, sims, w_gnn, b_gnn, att_w1, att_w2, w_f, b_f)
    f_meta, a_meta, preds = jax.block_until_ready(out)

    ref = reference_forward(features, sims, w_gnn, b_gnn, att_w1, att_w2, w_f, b_f)
    for got, want, name in zip((f_meta, a_meta, preds), ref,
                               ("f_meta", "A_meta", "predictions")):
        assert got.shape == want.shape, name
        assert bool(jnp.all(jnp.isfinite(got))), name
        assert bool(jnp.allclose(got, want, rtol=5e-2, atol=5e-2)), name

    print("KERNEL_OK")
</pallas_src>

<mosaic_0001>
module attributes {stable_mosaic.version = 11 : i64} {
  func.func @gcn_prep_kernel(%arg0: i32, %arg1: i32, %arg2: memref<1x128x128xf32, #tpu.memory_space<vmem>>, %arg3: memref<128x32xf32, #tpu.memory_space<vmem>>, %arg4: memref<1x32x16xf32, #tpu.memory_space<vmem>>, %arg5: memref<1x128x1xf32, #tpu.memory_space<vmem>>, %arg6: memref<1x128x16xf32, #tpu.memory_space<vmem>>) attributes {dimension_semantics = [#tpu.dimension_semantics<arbitrary>, #tpu.dimension_semantics<parallel>], iteration_bounds = array<i64: 3, 1>, scalar_prefetch = 0 : i64, scratch_operands = 0 : i64, tpu.core_type = #tpu.core_type<tc>, window_params = [{transform_indices = @transform_0, window_bounds = array<i64: 1, 128, 128>}, {transform_indices = @transform_1, window_bounds = array<i64: 128, 32>}, {transform_indices = @transform_2, window_bounds = array<i64: 1, 32, 16>}, {transform_indices = @transform_3, window_bounds = array<i64: 1, 128, 1>}, {transform_indices = @transform_4, window_bounds = array<i64: 1, 128, 16>}]} {
    %c0 = arith.constant 0 : index
    %c0_0 = arith.constant 0 : index
    %c0_1 = arith.constant 0 : index
    %0 = vector.load %arg2[%c0, %c0_0, %c0_1] : memref<1x128x128xf32, #tpu.memory_space<vmem>>, vector<1x128x128xf32>
    %1 = vector.shape_cast %0 : vector<1x128x128xf32> to vector<128x128xf32>
    %2 = tpu.iota {dimensions = array<i32: 0>} : vector<128x128xi32>
    %3 = tpu.iota {dimensions = array<i32: 1>} : vector<128x128xi32>
    %cst = arith.constant 0.000000e+00 : f32
    %4 = vector.broadcast %cst : f32 to vector<128x128xf32>
    %5 = arith.cmpf one, %1, %4 : vector<128x128xf32>
    %c128_i32 = arith.constant 128 : i32
    %6 = arith.muli %arg1, %c128_i32 : i32
    %7 = vector.broadcast %6 : i32 to vector<128x128xi32>
    %8 = arith.addi %3, %7 : vector<128x128xi32>
    %9 = arith.cmpi ne, %2, %8 : vector<128x128xi32>
    %10 = arith.andi %5, %9 : vector<128x128xi1>
    %cst_2 = arith.constant 1.000000e+00 : f32
    %cst_3 = arith.constant 0.000000e+00 : f32
    %11 = vector.broadcast %cst_2 : f32 to vector<128x128xf32>
    %12 = vector.broadcast %cst_3 : f32 to vector<128x128xf32>
    %13 = arith.select %10, %11, %12 : vector<128x128xi1>, vector<128x128xf32>
    %cst_4 = arith.constant 1.000000e+00 : f32
    %14 = vector.broadcast %cst_4 : f32 to vector<128x1xf32>
    %cst_5 = arith.constant dense<0.000000e+00> : vector<128x1xf32>
    %15 = tpu.matmul %13, %14, %cst_5 {dimension_numbers = #tpu.dot_dimension_numbers<[0], [0], [1], [1], [0, 1, 1, 1], [], []>} : vector<128x128xf32>, vector<128x1xf32>, vector<128x1xf32> -> vector<128x1xf32>
    %cst_6 = arith.constant 1.000000e+00 : f32
    %16 = vector.broadcast %cst_6 : f32 to vector<128x1xf32>
    %17 = arith.addf %15, %16 : vector<128x1xf32>
    %18 = math.rsqrt %17 : vector<128x1xf32>
    %c0_7 = arith.constant 0 : index
    %c0_8 = arith.constant 0 : index
    %19 = vector.load %arg3[%c0_7, %c0_8] : memref<128x32xf32, #tpu.memory_space<vmem>>, vector<128x32xf32>
    %c0_9 = arith.constant 0 : index
    %c0_10 = arith.constant 0 : index
    %c0_11 = arith.constant 0 : index
    %20 = vector.load %arg4[%c0_9, %c0_10, %c0_11] : memref<1x32x16xf32, #tpu.memory_space<vmem>>, vector<1x32x16xf32>
    %21 = vector.shape_cast %20 : vector<1x32x16xf32> to vector<32x16xf32>
    %cst_12 = arith.constant dense<0.000000e+00> : vector<128x16xf32>
    %22 = tpu.matmul %19, %21, %cst_12 {dimension_numbers = #tpu.dot_dimension_numbers<[1], [0], [0], [1], [0, 0, 1, 1], [], []>} : vector<128x32xf32>, vector<32x16xf32>, vector<128x16xf32> -> vector<128x16xf32>
    %c0_13 = arith.constant 0 : index
    %c0_14 = arith.constant 0 : index
    %c0_15 = arith.constant 0 : index
    %23 = vector.load %arg5[%c0_13, %c0_14, %c0_15] : memref<1x128x1xf32, #tpu.memory_space<vmem>>, vector<1x128x1xf32>
    %24 = vector.shape_cast %23 : vector<1x128x1xf32> to vector<128x1xf32>
    %25 = vector.shape_cast %18 : vector<128x1xf32> to vector<1x128x1xf32>
    tpu.vector_store %arg5[%c0_13, %c0_14, %c0_15], %25 {strides = array<i32>} : memref<1x128x1xf32, #tpu.memory_space<vmem>>, vector<1x128x1xf32>,
    %26 = vector.broadcast %18 : vector<128x1xf32> to vector<128x16xf32>
    %27 = arith.mulf %26, %22 : vector<128x16xf32>
    %c0_16 = arith.constant 0 : index
    %c0_17 = arith.constant 0 : index
    %c0_18 = arith.constant 0 : index
    %28 = vector.load %arg6[%c0_16, %c0_17, %c0_18] : memref<1x128x16xf32, #tpu.memory_space<vmem>>, vector<1x128x16xf32>
    %29 = vector.shape_cast %28 : vector<1x128x16xf32> to vector<128x16xf32>
    %30 = vector.shape_cast %27 : vector<128x16xf32> to vector<1x128x16xf32>
    tpu.vector_store %arg6[%c0_16, %c0_17, %c0_18], %30 {strides = array<i32>} : memref<1x128x16xf32, #tpu.memory_space<vmem>>, vector<1x128x16xf32>,
    return
  }
  func.func @transform_0(%arg0: i32, %arg1: i32) -> (i32, i32, i32) {
    %c0_i32 = arith.constant 0 : i32
    %c0_i32_0 = arith.constant 0 : i32
    return %arg0, %c0_i32, %arg1 : i32, i32, i32
  }
  func.func @transform_1(%arg0: i32, %arg1: i32) -> (i32, i32) {
    %c0_i32 = arith.constant 0 : i32
    %c0_i32_0 = arith.constant 0 : i32
    return %arg1, %c0_i32 : i32, i32
  }
  func.func @transform_2(%arg0: i32, %arg1: i32) -> (i32, i32, i32) {
    %c0_i32 = arith.constant 0 : i32
    %c0_i32_0 = arith.constant 0 : i32
    %c0_i32_1 = arith.constant 0 : i32
    return %arg0, %c0_i32, %c0_i32_0 : i32, i32, i32
  }
  func.func @transform_3(%arg0: i32, %arg1: i32) -> (i32, i32, i32) {
    %c0_i32 = arith.constant 0 : i32
    %c0_i32_0 = arith.constant 0 : i32
    return %arg0, %arg1, %c0_i32 : i32, i32, i32
  }
  func.func @transform_4(%arg0: i32, %arg1: i32) -> (i32, i32, i32) {
    %c0_i32 = arith.constant 0 : i32
    %c0_i32_0 = arith.constant 0 : i32
    return %arg0, %arg1, %c0_i32 : i32, i32, i32
  }
}

</mosaic_0001>

<bundles_post_ra>
// kernel: tpu_custom_call.1
= control target key start
LH: loop header
LB: loop body
LE: loop exit
PB: predicated region body
PF: predicated region fallthrough
CT: control target
= control target key end

     0   :  { %10 = vsyncpa [#allocation3], 0  ;;  %s1918_s0 = inlined_call_operand.hbm [shape: f32[3,128,128], index: 0, kind: input, shape index: {}]   ;;  %s1919_s1 = inlined_call_operand.vmem [shape: f32[128,32], index: 1, kind: input, shape index: {}]   ;;  %s1920_s2 = inlined_call_operand.vmem [shape: f32[3,32,16], index: 2, kind: input, shape index: {}]   ;;  %s1921_s3 = inlined_call_operand.vmem [shape: f32[3,128,1], index: 3, kind: output, shape index: {0}]   ;;  %s1922_s4 = inlined_call_operand.vmem [shape: f32[3,128,16], index: 4, kind: output, shape index: {1}]  }
   0x1   :  { %12 = vsyncpa [#allocation3 + $0x1], 0  ;;  %s1529_s15 = smov 0   ;;  %s1531_s16 = smov 0  }
   0x2   :  { %s1533_s17 = smov 0   ;;  %s1535_s18 = smov 0  }
   0x3   :  { %s1537_s19 = smov 0   ;;  %s1539_s20 = smov 0  }
   0x4 LB: > { %s1120_s21 = sadd.s32 4294967295, %s1496_s20   ;;  %s30_s22 = sadd.s32 1, %s1492_s19  ;;  %s1496_s20 = sphi %s1539_s20, %s18_s20   ;;  %s1492_s19 = sphi %s1537_s19, %s1930_s19   ;;  %s1488_s18 = sphi %s1535_s18, %s1929_s18   ;;  %s1484_s17 = sphi %s1533_s17, %s1928_s17   ;;  %s1480_s16 = sphi %s1531_s16, %s1927_s16   ;;  %s1476_s15 = sphi %s1529_s15, %s1926_s15  }
   0x5   : > { %p32_p0 = scmp.ge.s32.totalorder %s30_s22, 3  ;;  %s39_s23 = sadd.s32 1, %s1484_s17 }
   0x6   : > { %p46_p1 = scmp.ne.s32.totalorder %s1484_s17, %s1480_s16  ;;  %p47_p2 = scmp.eq.s32.totalorder %s1496_s20, 0 }
   0x7   : > { %s1932_s22 = smov (%p32_p0, %s30_s22), 0  ;;  %p52_p4 = scmp.ne.s32.totalorder %s1480_s16, %s1476_s15 }
   0x8   : > { %p1565_p3 = por %p47_p2, %p46_p1  ;;  %s34_s25 = ssub.s32 %s1492_s19, %s1932_s22 }
   0x9   : > { %p53_p5 = scmp.eq.s32.totalorder %s1120_s21, 0  ;;  %p37_p6 = scmp.eq.s32.totalorder %s34_s25, 0 }
   0xa   : > { %p1328_p8 = scmp.lt.s32.totalorder %s1496_s20, 3  ;;  %s193_s28 = sand.u32 1, %s1484_s17  }
   0xb   : > { %p1572_p7 = por %p53_p5, %p52_p4  ;;  %s1154_s29 = sshll.u32 %s1492_s19, 11 }
   0xc   : > { %s1578_s27 = scalar_select %p37_p6, %s1484_s17, %s39_s23  }
   0xd   : > { %s1125_s30 = sshll.u32 %s193_s28, 7  ;;  %s1585_s7 = scalar_lea.hbm %s1918_s0, %s1154_s29 }
   0xe   : > { %s197_s8 = scalar_lea.vmem [#allocation2], %s1125_s30  ;;  %p1589_p9 = pnand %p1328_p8, %p1565_p3 }
   0xf   : > { %s205_s9 = sshll.u32 %s197_s8, 4  ;;  %s1595_s11 = scalar_lea.sflag [#allocation3], %s193_s28  ;;  %s1593_s9 = int_to_ptr.vmem [resolvable:$true] %s205_s9 }
  0x10   : > { %s1416_s12 = scalar_lea.hbm %s1585_s7, 2048  ;;  %p1418_p11 = pneg %p1589_p9 }
  0x11   : > { %p1417_p10 = scmp.ne.s32.totalorder %s1585_s7, %s1416_s12  ;;  %s1421_s15 = scalar_lea.hbm %s1918_s0, 6144 }
  0x12   : > { %p1422_p0 = scmp.lt.u32.totalorder %s1585_s7, %s1918_s0  ;;  %p1423_p1 = scmp.lt.u32.totalorder %s1421_s15, %s1416_s12 }
  0x13   : > { %p1419_p12 = pnand %p1418_p11, %p1417_p10  ;;  %p1425_p3 = scmp.lt.u32.totalorder %s1416_s12, %s1585_s7 }
  0x14   : > { %p1424_p2 = por %p1423_p1, %p1422_p0 }
  0x15   : > { %p1420_p13 = pneg %p1419_p12 }
  0x16   : > { %p1426_p4 = por %p1425_p3, %p1424_p2 }
  0x18   : > { %p1427_p5 = pnand %p1426_p4, %p1420_p13 }
  0x1a   : > { %1430 = shalt.err (!%p1427_p5)
}
  0x1b   : > { %s1431_s24 = scalar_lea.vmem %s1593_s9, 2048  ;;  %s1498_s25 = smov [#allocation2]  }
  0x1c   : > { %p1432_p6 = scmp.ne.s32.totalorder %s1593_s9, %s1431_s24  ;;  %s1436_s28 = sshll.u32 %s1498_s25, 4  ;;  %s1437_s28 = int_to_ptr.vmem [resolvable:$false] %s1436_s28 }
  0x1d   : > { %s1438_s29 = scalar_lea.vmem %s1437_s28, 4096  ;;  %p1439_p12 = scmp.lt.s32.totalorder %s1593_s9, %s1437_s28 }
  0x1e   : > { %p1434_p8 = pnand %p1432_p6, %p1418_p11  ;;  %p1440_p0 = scmp.lt.s32.totalorder %s1438_s29, %s1431_s24 }
  0x20   : > { %p1435_p10 = pneg %p1434_p8  ;;  %p1441_p1 = por %p1440_p0, %p1439_p12 }
  0x22   : > { %p1442_p2 = pnand %p1441_p1, %p1435_p10 }
  0x24   : > { %1445 = shalt.err (!%p1442_p2)
}
  0x25   : > { %s1499_s30 = smov 128   ;;  %s1500_s5 = smov 8  }
  0x26   : > { %1327 = dma.hbm_to_vmem [thread:$0]  (!%p1589_p9), %s1585_s7, 2048, %s1593_s9, %s1595_s11, %s1499_s30, %s1499_s30, %s1500_s5  }
  0x27   : > { %p1128_p11 = scmp.ge.s32.totalorder %s1496_s20, 1  ;;  %p221_p13 = scmp.lt.s32.totalorder %s1496_s20, 4 }
  0x29   : > { %p222_p3 = pnand %p1128_p11, %p221_p13 }
  0x2a   : > { %s227_s6 = sand.u32 (!%p222_p3), 1, %s1480_s16  }
  0x2b   : > { %225 = sbr.rel (%p222_p3) target bundleno = 608 (0x260), region = 32  ;;  %s1129_s8 = sshll.u32 (!%p222_p3), %s227_s6, 7 }
  0x2c   : > { %s228_s12 = scalar_lea.sflag (!%p222_p3), [#allocation3], %s227_s6  ;;  %s1626_s13 = scalar_lea.vmem (!%p222_p3), [#allocation2], %s1129_s8 }
  0x32   : > { %1471 = dma.done.wait (%p1572_p7), %s228_s12, 2048  }
  0x33   : > { %1473 = vsyncadd (%p1572_p7), %s228_s12, 4294965248  ;;  %v326_v0 = vlaneseq  ;;  %v1501_v1 = vmov 1.0|1.0   ;;  %v310_v6 = vld [vmem:[%s1626_s13] sm:$0xff]  ;;  %v311_v7 = vld [vmem:[%s1626_s13 + $0x8] sm:$0xff]  ;;  %v1502_v9 = vmov 0.0  }
  0x34   : > { %1298 = vmatprep.subr.bf16.mxu0 %v1501_v1  ;;  %v312_v8 = vld [vmem:[%s1626_s13 + $0x10] sm:$0xff]  ;;  %vm345_vm2 = vcmp.ne.f32.partialorder %v310_v6, 0.0  ;;  %vm346_vm3 = vcmp.ne.f32.partialorder %v311_v7, 0.0  ;;  %v313_v12 = vld [vmem:[%s1626_s13 + $0x18] sm:$0xff]  ;;  %v314_v15 = vld [vmem:[%s1626_s13 + $0x20] sm:$0xff]  ;;  %p285_p7 = scmp.lt.s32.totalorder %s1488_s18, 2 }
  0x35   : > { %v1633_v2 = vshrl.u32 %v326_v0, 7  ;;  %v1635_v3 = vand.u32 127, %v326_v0  ;;  %1299 = vmatpush3.bf16.msra.mxu0 %v1501_v1  ;;  %vm347_vm6 = vcmp.ne.f32.partialorder %v312_v8, 0.0  ;;  %vm348_vm9 = vcmp.ne.f32.partialorder %v313_v12, 0.0  ;;  %v315_v18 = vld [vmem:[%s1626_s13 + $0x28] sm:$0xff]  ;;  %v316_v21 = vld [vmem:[%s1626_s13 + $0x30] sm:$0xff] }
  0x36   : > { %1300 = vmatprep.subr.bf16.mxu0 %v1501_v1  ;;  %vm349_vm12 = vcmp.ne.f32.partialorder %v314_v15, 0.0  ;;  %vm350_vm15 = vcmp.ne.f32.partialorder %v315_v18, 0.0  ;;  %v317_v24 = vld [vmem:[%s1626_s13 + $0x38] sm:$0xff]  ;;  %v318_v27 = vld [vmem:[%s1626_s13 + $0x40] sm:$0xff]  ;;  %v319_v30 = vld [vmem:[%s1626_s13 + $0x48] sm:$0xff]  ;;  %s1934_s18 = smov (!%p285_p7, %s1488_s18), 2 }
  0x37   : > { %v328_v4 = vadd.s32 8, %v1633_v2  ;;  %vm364_vm0 = vcmp.ne.s32.totalorder %v1633_v2, %v1635_v3  ;;  %v329_v5 = vadd.s32 16, %v1633_v2  ;;  %v330_v11 = vadd.s32 24, %v1633_v2  ;;  %v320_v33 = vld [vmem:[%s1626_s13 + $0x50] sm:$0xff]  ;;  %v321_v36 = vld [vmem:[%s1626_s13 + $0x58] sm:$0xff]  ;;  %v322_v39 = vld [vmem:[%s1626_s13 + $0x60] sm:$0xff] }
  0x38   : > { %vm380_vm4 = vmand %vm345_vm2, %vm364_vm0  ;;  %v331_v14 = vadd.s32 32, %v1633_v2  ;;  %v332_v17 = vadd.s32 40, %v1633_v2  ;;  %v333_v20 = vadd.s32 48, %v1633_v2  ;;  %vm351_vm2 = vcmp.ne.f32.partialorder %v316_v21, 0.0  ;;  %v323_v42 = vld [vmem:[%s1626_s13 + $0x68] sm:$0xff]  ;;  %v324_v45 = vld [vmem:[%s1626_s13 + $0x70] sm:$0xff] }
  0x39   : > { %1301 = vmatpush3.bf16.msra.mxu0 %v1501_v1  ;;  %vm365_vm1 = vcmp.ne.s32.totalorder %v328_v4, %v1635_v3  ;;  %v396_v10 = vsel %vm380_vm4, 1.0, %v1502_v9  ;;  %vm366_vm7 = vcmp.ne.s32.totalorder %v329_v5, %v1635_v3  ;;  %vm367_vm10 = vcmp.ne.s32.totalorder %v330_v11, %v1635_v3  ;;  %v325_v48 = vld [vmem:[%s1626_s13 + $0x78] sm:$0xff]  ;;  %v605_v52 = vld [vmem:[%s1919_s1] sm:$0xff]  ;;  %s1155_s9 = sshll.u32 %s1934_s18, 5  ;;  %v606_v59 = vld [vmem:[%s1919_s1 + $0x8] sm:$0xff]  ;;  %s1156_s12 = sshll.u32 %s1934_s18, 7 }
  0x3a   : > { %1302 = vmatprep.subr.bf16.mxu0 %v1501_v1  ;;  %vm381_vm5 = vmand %vm346_vm3, %vm365_vm1  ;;  %412 = vxpose.xlu0.b32.start [1/16] %v396_v10, 128  ;;  %vm368_vm13 = vcmp.ne.s32.totalorder %v331_v14, %v1635_v3  ;;  %vm369_vm0 = vcmp.ne.s32.totalorder %v332_v17, %v1635_v3  ;;  %vm370_vm3 = vcmp.ne.s32.totalorder %v333_v20, %v1635_v3  ;;  %v334_v23 = vadd.s32 56, %v1633_v2  ;;  %s289_s14 = scalar_lea.vmem %s1920_s2, %s1155_s9  ;;  %v607_v60 = vld [vmem:[%s1919_s1 + $0x10] sm:$0xff]  ;;  %v608_v61 = vld [vmem:[%s1919_s1 + $0x18] sm:$0xff]  ;;  %s1796_s7 = scalar_lea.vmem %s1921_s3, %s1156_s12 }
  0x3b   : > { %v397_v13 = vsel %vm381_vm5, 1.0, %v1502_v9  ;;  %vm382_vm8 = vmand %vm347_vm6, %vm366_vm7  ;;  %vm352_vm5 = vcmp.ne.f32.partialorder %v317_v24, 0.0  ;;  %v335_v26 = vadd.s32 64, %v1633_v2  ;;  %v336_v29 = vadd.s32 72, %v1633_v2  ;;  %v621_v53 = vld [vmem:[%s289_s14] sm:$0xff]  ;;  %v622_v54 = vld [vmem:[%s289_s14 + $0x8] sm:$0xff]  ;;  %s1855_s11 = scalar_lea.vmem %s1922_s4, %s1156_s12 }
  0x3c   : > { %v398_v16 = vsel %vm382_vm8, 1.0, %v1502_v9  ;;  %vm383_vm11 = vmand %vm348_vm9, %vm367_vm10  ;;  %vm371_vm6 = vcmp.ne.s32.totalorder %v334_v23, %v1635_v3  ;;  %vm353_vm8 = vcmp.ne.f32.partialorder %v318_v27, 0.0  ;;  %v337_v32 = vadd.s32 80, %v1633_v2  ;;  %v623_v55 = vld [vmem:[%s289_s14 + $0x10] sm:$0xff]  ;;  %v624_v57 = vld [vmem:[%s289_s14 + $0x18] sm:$0xff] }
  0x3d   : > { %1303 = vmatpush3.bf16.msra.mxu0 %v1501_v1  ;;  %v399_v19 = vsel %vm383_vm11, 1.0, %v1502_v9  ;;  %vm384_vm14 = vmand %vm349_vm12, %vm368_vm13  ;;  %vm372_vm9 = vcmp.ne.s32.totalorder %v335_v26, %v1635_v3  ;;  %vm354_vm11 = vcmp.ne.f32.partialorder %v319_v30, 0.0  ;;  %vm373_vm12 = vcmp.ne.s32.totalorder %v336_v29, %v1635_v3  ;;  %v609_v62 = vld [vmem:[%s1919_s1 + $0x20] sm:$0xff]  ;;  %v610_v63 = vld [vmem:[%s1919_s1 + $0x28] sm:$0xff] }
  0x3e   : > { %1304 = vmatprep.subr.bf16.mxu0 %v1501_v1  ;;  %413 = vxpose.xlu0.b32.cont [2/16] %v397_v13, 128  ;;  %v400_v22 = vsel %vm384_vm14, 1.0, %v1502_v9  ;;  %vm385_vm1 = vmand %vm350_vm15, %vm369_vm0  ;;  %vm355_vm14 = vcmp.ne.f32.partialorder %v320_v33, 0.0  ;;  %vm374_vm15 = vcmp.ne.s32.totalorder %v337_v32, %v1635_v3  ;;  %v338_v35 = vadd.s32 88, %v1633_v2  ;;  %v611_v0 = vld [vmem:[%s1919_s1 + $0x30] sm:$0xff]  ;;  %v616_v5 = vld [vmem:[%s1919_s1 + $0x58] sm:$0xff] }
  0x3f   : > { %v401_v25 = vsel %vm385_vm1, 1.0, %v1502_v9  ;;  %vm386_vm4 = vmand %vm351_vm2, %vm370_vm3  ;;  %vm356_vm1 = vcmp.ne.f32.partialorder %v321_v36, 0.0  ;;  %v339_v38 = vadd.s32 96, %v1633_v2  ;;  %v340_v41 = vadd.s32 104, %v1633_v2  ;;  %v615_v4 = vld [vmem:[%s1919_s1 + $0x50] sm:$0xff]  ;;  %v617_v6 = vld [vmem:[%s1919_s1 + $0x60] sm:$0xff] }
  0x40   : > { %v402_v28 = vsel %vm386_vm4, 1.0, %v1502_v9  ;;  %vm387_vm7 = vmand %vm352_vm5, %vm371_vm6  ;;  %vm375_vm2 = vcmp.ne.s32.totalorder %v338_v35, %v1635_v3  ;;  %vm357_vm4 = vcmp.ne.f32.partialorder %v322_v39, 0.0  ;;  %v341_v44 = vadd.s32 112, %v1633_v2  ;;  %v618_v7 = vld [vmem:[%s1919_s1 + $0x68] sm:$0xff]  ;;  %v619_v8 = vld [vmem:[%s1919_s1 + $0x70] sm:$0xff] }
  0x41   : > { %1305 = vmatpush3.bf16.msra.mxu0 %v1501_v1  ;;  %v403_v31 = vsel %vm387_vm7, 1.0, %v1502_v9  ;;  %vm388_vm10 = vmand %vm353_vm8, %vm372_vm9  ;;  %vm376_vm5 = vcmp.ne.s32.totalorder %v339_v38, %v1635_v3  ;;  %vm358_vm7 = vcmp.ne.f32.partialorder %v323_v42, 0.0  ;;  %vm377_vm8 = vcmp.ne.s32.totalorder %v340_v41, %v1635_v3 }
  0x42   : > { %1306 = vmatprep.subr.bf16.mxu0 %v1501_v1  ;;  %414 = vxpose.xlu0.b32.cont [3/16] %v398_v16, 128  ;;  %v404_v34 = vsel %vm388_vm10, 1.0, %v1502_v9  ;;  %vm389_vm13 = vmand %vm354_vm11, %vm373_vm12  ;;  %vm359_vm10 = vcmp.ne.f32.partialorder %v324_v45, 0.0  ;;  %vm378_vm11 = vcmp.ne.s32.totalorder %v341_v44, %v1635_v3  ;;  %v342_v47 = vadd.s32 120, %v1633_v2  ;;  %v613_v2 = vld [vmem:[%s1919_s1 + $0x40] sm:$0xff] }
  0x43   : > { %v405_v37 = vsel %vm389_vm13, 1.0, %v1502_v9  ;;  %vm390_vm0 = vmand %vm355_vm14, %vm374_vm15  ;;  %vm360_vm13 = vcmp.ne.f32.partialorder %v325_v48, 0.0  ;;  %v1314_v56 = vpack.c.bf16 %v622_v54, %v621_v53  ;;  %v1318_v58 = vpack.c.bf16 %v624_v57, %v623_v55 }
  0x44   : > { %v406_v40 = vsel %vm390_vm0, 1.0, %v1502_v9  ;;  %vm391_vm3 = vmand %vm356_vm1, %vm375_vm2  ;;  %vm379_vm14 = vcmp.ne.s32.totalorder %v342_v47, %v1635_v3  ;;  %vm625_vm0 = vcmask 261120   ;;  %v614_v3 = vld [vmem:[%s1919_s1 + $0x48] sm:$0xff]  ;;  %v1503_v26 = vmov 0  }
  0x45   : > { %1307 = vmatpush3.bf16.msra.mxu0 %v1501_v1  ;;  %v407_v43 = vsel %vm391_vm3, 1.0, %v1502_v9  ;;  %vm392_vm6 = vmand %vm357_vm4, %vm376_vm5  ;;  %1274 = vmatprep.mubr.msk.f32.mxu1 %vm625_vm0, %v605_v52  ;;  %vm819_vm1 = vcmask 7168   ;;  %vm932_vm2 = vcmask 130048  }
  0x46   : > { %1308 = vmatprep.subr.bf16.mxu0 %v1501_v1  ;;  %415 = vxpose.xlu0.b32.cont [4/16] %v399_v19, 128  ;;  %v408_v46 = vsel %vm392_vm6, 1.0, %v1502_v9  ;;  %vm393_vm9 = vmand %vm358_vm7, %vm377_vm8 }
  0x47   : > { %v409_v49 = vsel %vm393_vm9, 1.0, %v1502_v9  ;;  %vm394_vm12 = vmand %vm359_vm10, %vm378_vm11  ;;  %1315 = vmatprep.subr.bf16.mxu1 %v1314_v56  ;;  %1382 = vset.pattern.permute.xlu1 %v1503_v26 }
  0x48   : > { %v410_v50 = vsel %vm394_vm12, 1.0, %v1502_v9  ;;  %vm395_vm15 = vmand %vm360_vm13, %vm379_vm14  ;;  %1317 = vmatpush3.bf16.msra.mxu1 %v1314_v56 }
  0x49   : > { %1309 = vmatpush3.bf16.msra.mxu0 %v1501_v1  ;;  %v411_v51 = vsel %vm395_vm15, 1.0, %v1502_v9  ;;  %1319 = vmatprep.subr.bf16.mxu1 %v1318_v58  ;;  %v620_v9 = vld [vmem:[%s1919_s1 + $0x78] sm:$0xff] }
  0x4a   : > { %1310 = vmatprep.subr.bf16.mxu0 %v1501_v1  ;;  %416 = vxpose.xlu0.b32.cont [5/16] %v400_v22, 128 }
  0x4c   : > { %1321 = vmatpush3.bf16.msra.mxu1 %v1318_v58 }
  0x4d   : > { %1311 = vmatpush3.bf16.msra.mxu0 %v1501_v1 }
  0x4e   : > { %1312 = vmatprep.subr.bf16.mxu0 %v1501_v1  ;;  %417 = vxpose.xlu0.b32.cont [6/16] %v401_v25, 128 }
  0x4f   : > { %1275 = vmatmul.mubr.msk.f32.vlgmr.msra.gmra.mrb[0].mxu1 %vm625_vm0, %v606_v59 }
  0x50   : > { %1277 = vmatprep.mubr.msk.f32.mxu1 %vm625_vm0, %v607_v60 }
  0x51   : > { %1313 = vmatpush3.bf16.msra.mxu0 %v1501_v1  ;;  %v612_v1 = vld [vmem:[%s1919_s1 + $0x38] sm:$0xff] }
  0x52   : > { %418 = vxpose.xlu0.b32.cont [7/16] %v402_v28, 128 }
  0x53   : > { %1278 = vmatmul.mubr.msk.f32.gmra.mrb[2].mxu1 %vm625_vm0, %v608_v61 }
  0x54   : > { %1280 = vmatprep.mubr.msk.f32.mxu1 %vm625_vm0, %v609_v62 }
  0x56   : > { %419 = vxpose.xlu0.b32.cont [8/16] %v403_v31, 128 }
  0x57   : > { %1281 = vmatmul.mubr.msk.f32.gmra.mrb[4].mxu1 %vm625_vm0, %v610_v63 }
  0x58   : > { %1283 = vmatprep.mubr.msk.f32.mxu1 %vm625_vm0, %v611_v0 }
  0x5a   : > { %420 = vxpose.xlu0.b32.cont [9/16] %v404_v34, 128 }
  0x5b   : > { %1284 = vmatmul.mubr.msk.f32.gmra.mrb[6].mxu1 %vm625_vm0, %v612_v1 }
  0x5c   : > { %1286 = vmatprep.mubr.msk.f32.mxu1 %vm625_vm0, %v613_v2 }
  0x5e   : > { %421 = vxpose.xlu0.b32.cont [10/16] %v405_v37, 128 }
  0x5f   : > { %1287 = vmatmul.mubr.msk.f32.gmra.mrb[8].mxu1 %vm625_vm0, %v614_v3 }
  0x60   : > { %1289 = vmatprep.mubr.msk.f32.mxu1 %vm625_vm0, %v615_v4 }
  0x62   : > { %422 = vxpose.xlu0.b32.cont [11/16] %v406_v40, 128 }
  0x63   : > { %1290 = vmatmul.mubr.msk.f32.gmra.mrb[10].mxu1 %vm625_vm0, %v616_v5 }
  0x64   : > { %1292 = vmatprep.mubr.msk.f32.mxu1 %vm625_vm0, %v617_v6 }
  0x66   : > { %423 = vxpose.xlu0.b32.cont [12/16] %v407_v43, 128 }
  0x67   : > { %1293 = vmatmul.mubr.msk.f32.gmra.mrb[12].mxu1 %vm625_vm0, %v618_v7 }
  0x68   : > { %1295 = vmatprep.mubr.msk.f32.mxu1 %vm625_vm0, %v619_v8 }
  0x6a   : > { %424 = vxpose.xlu0.b32.cont [13/16] %v408_v46, 128 }
  0x6b   : > { %1296 = vmatmul.mubr.msk.f32.gmra.mrb[14].mxu1 %vm625_vm0, %v620_v9 }
  0x6e   : > { %425 = vxpose.xlu0.b32.cont [14/16] %v409_v49, 128 }
  0x72   : > { %426 = vxpose.xlu0.b32.cont [15/16] %v410_v50, 128 }
  0x76   : > { %427 = vxpose.xlu0.b32.end [16/16] %v411_v51, 128 }
  0x9f   : > { %1383 = vset.pattern.permute.xlu0 %v1503_v26 }
  0xba   : > { %v428_v10 = vpop.trf.xlu0 }
  0xbb   : > { %1242 = vmatprep.mubr.f32.mxu0 %v428_v10 }
  0xbe   : > { %v429_v11 = vpop.trf.xlu0 }
  0xbf   : > { %1243 = vmatmul.mubr.f32.vlgmr.msra.gmra.mrb[0].mxu0 %v429_v11 }
  0xc2   : > { %v430_v12 = vpop.trf.xlu0 }
  0xc3   : > { %1245 = vmatprep.mubr.f32.mxu0 %v430_v12 }
  0xc6   : > { %v431_v13 = vpop.trf.xlu0 }
  0xc7   : > { %1246 = vmatmul.mubr.f32.gmra.mrb[2].mxu0 %v431_v13 }
  0xca   : > { %v432_v14 = vpop.trf.xlu0 }
  0xcb   : > { %1248 = vmatprep.mubr.f32.mxu0 %v432_v14 }
  0xce   : > { %v433_v15 = vpop.trf.xlu0 }
  0xcf   : > { %1249 = vmatmul.mubr.f32.gmra.mrb[4].mxu0 %v433_v15 }
  0xd2   : > { %v434_v16 = vpop.trf.xlu0 }
  0xd3   : > { %1251 = vmatprep.mubr.f32.mxu0 %v434_v16 }
  0xd6   : > { %v435_v17 = vpop.trf.xlu0 }
  0xd7   : > { %1252 = vmatmul.mubr.f32.gmra.mrb[6].mxu0 %v435_v17 }
  0xda   : > { %v436_v18 = vpop.trf.xlu0 }
  0xdb   : > { %1254 = vmatprep.mubr.f32.mxu0 %v436_v18 }
  0xde   : > { %v437_v19 = vpop.trf.xlu0 }
  0xdf   : > { %1255 = vmatmul.mubr.f32.gmra.mrb[8].mxu0 %v437_v19 }
  0xe2   : > { %v438_v20 = vpop.trf.xlu0 }
  0xe3   : > { %1257 = vmatprep.mubr.f32.mxu0 %v438_v20 }
  0xe6   : > { %v439_v21 = vpop.trf.xlu0 }
  0xe7   : > { %1258 = vmatmul.mubr.f32.gmra.mrb[10].mxu0 %v439_v21 }
  0xea   : > { %v440_v22 = vpop.trf.xlu0 }
  0xeb   : > { %1260 = vmatprep.mubr.f32.mxu0 %v440_v22 }
  0xee   : > { %v441_v23 = vpop.trf.xlu0 }
  0xef   : > { %1261 = vmatmul.mubr.f32.gmra.mrb[12].mxu0 %v441_v23 }
  0xf2   : > { %v442_v24 = vpop.trf.xlu0 }
  0xf3   : > { %1263 = vmatprep.mubr.f32.mxu0 %v442_v24 }
  0xf6   : > { %v443_v25 = vpop.trf.xlu0 }
  0xf7   : > { %1264 = vmatmul.mubr.f32.gmra.mrb[14].mxu0 %v443_v25 }
 0x122   : > { %v1788_v27 = vpop.f32.mrb[0].mxu1 }
 0x123   : > { %v1802_v39 = vpop.f32.mrb[1].mxu1 }
 0x126   : > { %v1804_v43 = vpop.f32.mrb[2].mxu1 }
 0x127   : > { %v1810_v47 = vpop.f32.mrb[3].mxu1 }
 0x12a   : > { %v1812_v51 = vpop.f32.mrb[4].mxu1 }
 0x12b   : > { %v1818_v55 = vpop.f32.mrb[5].mxu1 }
 0x12e   : > { %v1820_v59 = vpop.f32.mrb[6].mxu1 }
 0x12f   : > { %v1826_v63 = vpop.f32.mrb[7].mxu1 }
 0x132   : > { %v1828_v3 = vpop.f32.mrb[8].mxu1 }
 0x133   : > { %v1834_v7 = vpop.f32.mrb[9].mxu1 }
 0x136   : > { %v1836_v11 = vpop.f32.mrb[10].mxu1 }
 0x137   : > { %v790_v15 = vpop.f32.mrb[11].mxu1 }
 0x13a   : > { %v1294_v19 = vpop.f32.mrb[12].mxu1 }
 0x13b   : > { %v800_v22 = vpop.f32.mrb[13].mxu1 }
 0x13e   : > { %v1297_v23 = vpop.f32.mrb[14].mxu1 }
 0x13f   : > { %v810_v25 = vpop.f32.mrb[15].mxu1 }
 0x192   : > { %v1244_v28 = vpop.f32.mrb[0].mxu0 }
 0x193   : > { %v516_v29 = vadd.f32 1.0, %v1244_v28  ;;  %v510_v30 = vpop.f32.mrb[1].mxu0 }
 0x194   : > { %v511_v31 = vadd.f32 1.0, %v510_v30 }
 0x195   : > { %1384 = vrsqrt.f32 %v516_v29 }
 0x196   : > { %1386 = vrsqrt.f32 %v511_v31 }
 0x19a   : > { %v1247_v32 = vpop.f32.mrb[2].mxu0 }
 0x19b   : > { %v526_v33 = vadd.f32 1.0, %v1247_v32  ;;  %v520_v34 = vpop.f32.mrb[3].mxu0 }
 0x19c   : > { %v521_v35 = vadd.f32 1.0, %v520_v34 }
 0x19d   : > { %1388 = vrsqrt.f32 %v526_v33 }
 0x19e   : > { %1390 = vrsqrt.f32 %v521_v35 }
 0x19f   : > { %v1385_v36 = vpop.eup %1384 }
 0x1a0   : > { %v1387_v37 = vpop.eup %1386  ;;  %821 = vst.msk [vmem:[%s1796_s7 + $0x8] sm:$0xff] %vm819_vm1, %v1385_v36  ;;  %843 = vperm.xlu1 %1382, %v1385_v36  }
 0x1a1   : > { %820 = vst.msk [vmem:[%s1796_s7] sm:$0xff] %vm819_vm1, %v1387_v37 }
 0x1a2   : > { %v1250_v38 = vpop.f32.mrb[4].mxu0 }
 0x1a3   : > { %v536_v40 = vadd.f32 1.0, %v1250_v38  ;;  %v530_v41 = vpop.f32.mrb[5].mxu0 }
 0x1a4   : > { %v531_v42 = vadd.f32 1.0, %v530_v41  ;;  %838 = vperm.xlu1 %1382, %v1387_v37  }
 0x1a5   : > { %1392 = vrsqrt.f32 %v536_v40 }
 0x1a6   : > { %1394 = vrsqrt.f32 %v531_v42 }
 0x1a7   : > { %v1389_v44 = vpop.eup %1388 }
 0x1a8   : > { %v1391_v45 = vpop.eup %1390  ;;  %823 = vst.msk [vmem:[%s1796_s7 + $0x18] sm:$0xff] %vm819_vm1, %v1389_v44  ;;  %853 = vperm.xlu1 %1382, %v1389_v44  }
 0x1a9   : > { %822 = vst.msk [vmem:[%s1796_s7 + $0x10] sm:$0xff] %vm819_vm1, %v1391_v45 }
 0x1aa   : > { %v1253_v46 = vpop.f32.mrb[6].mxu0 }
 0x1ab   : > { %v546_v48 = vadd.f32 1.0, %v1253_v46  ;;  %v540_v49 = vpop.f32.mrb[7].mxu0 }
 0x1ac   : > { %v541_v50 = vadd.f32 1.0, %v540_v49  ;;  %848 = vperm.xlu1 %1382, %v1391_v45  }
 0x1ad   : > { %1396 = vrsqrt.f32 %v546_v48 }
 0x1ae   : > { %1398 = vrsqrt.f32 %v541_v50 }
 0x1af   : > { %v1393_v52 = vpop.eup %1392 }
 0x1b0   : > { %v1395_v53 = vpop.eup %1394  ;;  %825 = vst.msk [vmem:[%s1796_s7 + $0x28] sm:$0xff] %vm819_vm1, %v1393_v52  ;;  %863 = vperm.xlu1 %1382, %v1393_v52  }
 0x1b1   : > { %824 = vst.msk [vmem:[%s1796_s7 + $0x20] sm:$0xff] %vm819_vm1, %v1395_v53 }
 0x1b2   : > { %v1256_v54 = vpop.f32.mrb[8].mxu0 }
 0x1b3   : > { %v556_v56 = vadd.f32 1.0, %v1256_v54  ;;  %v550_v57 = vpop.f32.mrb[9].mxu0 }
 0x1b4   : > { %v551_v58 = vadd.f32 1.0, %v550_v57  ;;  %858 = vperm.xlu1 %1382, %v1395_v53  }
 0x1b5   : > { %1400 = vrsqrt.f32 %v556_v56 }
 0x1b6   : > { %1402 = vrsqrt.f32 %v551_v58 }
 0x1b7   : > { %v1397_v60 = vpop.eup %1396 }
 0x1b8   : > { %v1399_v61 = vpop.eup %1398  ;;  %827 = vst.msk [vmem:[%s1796_s7 + $0x38] sm:$0xff] %vm819_vm1, %v1397_v60  ;;  %873 = vperm.xlu1 %1382, %v1397_v60  }
 0x1b9   : > { %826 = vst.msk [vmem:[%s1796_s7 + $0x30] sm:$0xff] %vm819_vm1, %v1399_v61 }
 0x1ba   : > { %v1259_v62 = vpop.f32.mrb[10].mxu0 }
 0x1bb   : > { %v566_v0 = vadd.f32 1.0, %v1259_v62  ;;  %v560_v1 = vpop.f32.mrb[11].mxu0 }
 0x1bc   : > { %v561_v2 = vadd.f32 1.0, %v560_v1  ;;  %868 = vperm.xlu1 %1382, %v1399_v61  }
 0x1bd   : > { %1404 = vrsqrt.f32 %v566_v0 }
 0x1be   : > { %1406 = vrsqrt.f32 %v561_v2 }
 0x1bf   : > { %v1401_v4 = vpop.eup %1400 }
 0x1c0   : > { %v1403_v5 = vpop.eup %1402  ;;  %829 = vst.msk [vmem:[%s1796_s7 + $0x48] sm:$0xff] %vm819_vm1, %v1401_v4  ;;  %883 = vperm.xlu1 %1382, %v1401_v4  }
 0x1c1   : > { %828 = vst.msk [vmem:[%s1796_s7 + $0x40] sm:$0xff] %vm819_vm1, %v1403_v5 }
 0x1c2   : > { %v1262_v6 = vpop.f32.mrb[12].mxu0 }
 0x1c3   : > { %v576_v8 = vadd.f32 1.0, %v1262_v6  ;;  %v570_v9 = vpop.f32.mrb[13].mxu0 }
 0x1c4   : > { %v571_v10 = vadd.f32 1.0, %v570_v9  ;;  %878 = vperm.xlu1 %1382, %v1403_v5  }
 0x1c5   : > { %1408 = vrsqrt.f32 %v576_v8 }
 0x1c6   : > { %1410 = vrsqrt.f32 %v571_v10 }
 0x1c7   : > { %v1405_v12 = vpop.eup %1404 }
 0x1c8   : > { %v1407_v13 = vpop.eup %1406  ;;  %831 = vst.msk [vmem:[%s1796_s7 + $0x58] sm:$0xff] %vm819_vm1, %v1405_v12  ;;  %893 = vperm.xlu1 %1382, %v1405_v12  }
 0x1c9   : > { %830 = vst.msk [vmem:[%s1796_s7 + $0x50] sm:$0xff] %vm819_vm1, %v1407_v13 }
 0x1ca   : > { %v1265_v14 = vpop.f32.mrb[14].mxu0 }
 0x1cb   : > { %v586_v16 = vadd.f32 1.0, %v1265_v14  ;;  %v580_v17 = vpop.f32.mrb[15].mxu0 }
 0x1cc   : > { %v581_v18 = vadd.f32 1.0, %v580_v17  ;;  %888 = vperm.xlu1 %1382, %v1407_v13  }
 0x1cd   : > { %1412 = vrsqrt.f32 %v586_v16 }
 0x1ce   : > { %1414 = vrsqrt.f32 %v581_v18 }
 0x1cf   : > { %v1409_v20 = vpop.eup %1408 }
 0x1d0   : > { %v1411_v21 = vpop.eup %1410  ;;  %833 = vst.msk [vmem:[%s1796_s7 + $0x68] sm:$0xff] %vm819_vm1, %v1409_v20  ;;  %903 = vperm.xlu1 %1382, %v1409_v20  }
 0x1d1   : > { %832 = vst.msk [vmem:[%s1796_s7 + $0x60] sm:$0xff] %vm819_vm1, %v1411_v21 }
 0x1d4   : > { %898 = vperm.xlu1 %1382, %v1411_v21  }
 0x1d7   : > { %v1413_v24 = vpop.eup %1412 }
 0x1d8   : > { %v1415_v26 = vpop.eup %1414  ;;  %835 = vst.msk [vmem:[%s1796_s7 + $0x78] sm:$0xff] %vm819_vm1, %v1413_v24 }
 0x1d9   : > { %834 = vst.msk [vmem:[%s1796_s7 + $0x70] sm:$0xff] %vm819_vm1, %v1415_v26  ;;  %908 = vperm.xlu1 %1382, %v1415_v26  }
 0x1dd   : > { %913 = vperm.xlu1 %1382, %v1413_v24  }
 0x21f   : > { %v844_v28 = vpop.permute.xlu1 %843 }
 0x220   : > { %v917_v29 = vmul.f32 %v1788_v27, %v844_v28 }
 0x222   : > { %934 = vst.msk [vmem:[%s1855_s11 + $0x8] sm:$0xff] %vm932_vm2, %v917_v29 }
 0x223   : > { %v839_v30 = vpop.permute.xlu1 %838 }
 0x224   : > { %v916_v31 = vmul.f32 %v839_v30, %v1802_v39 }
 0x226   : > { %933 = vst.msk [vmem:[%s1855_s11] sm:$0xff] %vm932_vm2, %v916_v31 }
 0x227   : > { %v854_v32 = vpop.permute.xlu1 %853 }
 0x228   : > { %v919_v33 = vmul.f32 %v1804_v43, %v854_v32 }
 0x22a   : > { %936 = vst.msk [vmem:[%s1855_s11 + $0x18] sm:$0xff] %vm932_vm2, %v919_v33 }
 0x22b   : > { %v849_v34 = vpop.permute.xlu1 %848 }
 0x22c   : > { %v918_v35 = vmul.f32 %v849_v34, %v1810_v47 }
 0x22e   : > { %935 = vst.msk [vmem:[%s1855_s11 + $0x10] sm:$0xff] %vm932_vm2, %v918_v35 }
 0x22f   : > { %v864_v27 = vpop.permute.xlu1 %863 }
 0x230   : > { %v921_v36 = vmul.f32 %v1812_v51, %v864_v27 }
 0x232   : > { %938 = vst.msk [vmem:[%s1855_s11 + $0x28] sm:$0xff] %vm932_vm2, %v921_v36 }
 0x233   : > { %v859_v37 = vpop.permute.xlu1 %858 }
 0x234   : > { %v920_v38 = vmul.f32 %v859_v37, %v1818_v55 }
 0x236   : > { %937 = vst.msk [vmem:[%s1855_s11 + $0x20] sm:$0xff] %vm932_vm2, %v920_v38 }
 0x237   : > { %v874_v39 = vpop.permute.xlu1 %873 }
 0x238   : > { %v923_v40 = vmul.f32 %v1820_v59, %v874_v39 }
 0x23a   : > { %940 = vst.msk [vmem:[%s1855_s11 + $0x38] sm:$0xff] %vm932_vm2, %v923_v40 }
 0x23b   : > { %v869_v41 = vpop.permute.xlu1 %868 }
 0x23c   : > { %v922_v42 = vmul.f32 %v869_v41, %v1826_v63 }
 0x23e   : > { %939 = vst.msk [vmem:[%s1855_s11 + $0x30] sm:$0xff] %vm932_vm2, %v922_v42 }
 0x23f   : > { %v884_v43 = vpop.permute.xlu1 %883 }
 0x240   : > { %v925_v44 = vmul.f32 %v1828_v3, %v884_v43 }
 0x242   : > { %942 = vst.msk [vmem:[%s1855_s11 + $0x48] sm:$0xff] %vm932_vm2, %v925_v44 }
 0x243   : > { %v879_v45 = vpop.permute.xlu1 %878 }
 0x244   : > { %v924_v46 = vmul.f32 %v879_v45, %v1834_v7 }
 0x246   : > { %941 = vst.msk [vmem:[%s1855_s11 + $0x40] sm:$0xff] %vm932_vm2, %v924_v46 }
 0x247   : > { %v894_v47 = vpop.permute.xlu1 %893 }
 0x248   : > { %v927_v48 = vmul.f32 %v1836_v11, %v894_v47 }
 0x24a   : > { %944 = vst.msk [vmem:[%s1855_s11 + $0x58] sm:$0xff] %vm932_vm2, %v927_v48 }
 0x24b   : > { %v889_v49 = vpop.permute.xlu1 %888 }
 0x24c   : > { %v926_v50 = vmul.f32 %v889_v49, %v790_v15 }
 0x24e   : > { %943 = vst.msk [vmem:[%s1855_s11 + $0x50] sm:$0xff] %vm932_vm2, %v926_v50 }
 0x24f   : > { %v904_v51 = vpop.permute.xlu1 %903 }
 0x250   : > { %v929_v52 = vmul.f32 %v1294_v19, %v904_v51 }
 0x252   : > { %946 = vst.msk [vmem:[%s1855_s11 + $0x68] sm:$0xff] %vm932_vm2, %v929_v52 }
 0x253   : > { %v899_v53 = vpop.permute.xlu1 %898 }
 0x254   : > { %v928_v54 = vmul.f32 %v899_v53, %v800_v22 }
 0x256   : > { %945 = vst.msk [vmem:[%s1855_s11 + $0x60] sm:$0xff] %vm932_vm2, %v928_v54 }
 0x258   : > { %v909_v55 = vpop.permute.xlu1 %908 }
 0x259   : > { %v930_v56 = vmul.f32 %v909_v55, %v810_v25 }
 0x25b   : > { %947 = vst.msk [vmem:[%s1855_s11 + $0x70] sm:$0xff] %vm932_vm2, %v930_v56 }
 0x25c   : > { %v914_v57 = vpop.permute.xlu1 %913 }
 0x25d   : > { %v931_v58 = vmul.f32 %v1297_v23, %v914_v57 }
 0x25f   : > { %948 = vst.msk [vmem:[%s1855_s11 + $0x78] sm:$0xff] %vm932_vm2, %v931_v58 }
 0x260 PF: > { %s18_s20 = sadd.s32 1, %s1496_s20   ;;  %s1926_s15 = smov %s1480_s16 }
 0x261   : > { %p15_p9 = scmp.ge.s32.totalorder %s18_s20, 5   ;;  %s1927_s16 = smov %s1484_s17 }
 0x262   : > { %s1928_s17 = smov %s1578_s27  ;;  %s1929_s18 = smov %s1492_s19 }
 0x263   : > { %s1930_s19 = smov %s1932_s22  ;;  %17 = sbr.rel (!%p15_p9) target bundleno = 4 (0x4), region = 90 }
 0x26a   :  { %1004 = vsyncpa [#allocation3], 1 }
 0x26b   :  { %1006 = vsyncpa [#allocation3 + $0x1], 1 }

</bundles_post_ra>
